<compile_context>
chip_gen: v5e
topology: v5e:2x2
jax: 0.10.0
libtpu: 0.0.40
codegen_flags: <defaults>
</compile_context>

<pallas_src>
import functools
import math

import jax
import jax.numpy as jnp
from jax import lax
from jax.experimental import pallas as pl
from jax.experimental.pallas import tpu as pltpu

_LANES = 128
_SUBLANES = 8
_NUM_MOMENTS = 5                      # Sx, Sy, Sxy, Sxx, Syy
_DEFAULT_BLOCK_BYTES = 2 * 1024 * 1024  # native-dtype bytes per input per step
_NUM_SPLITS = 2                       # leading "parallel" axis (2 TCs on v7x)


def _cdiv(a, b):
    return -(-a // b)


def _round_up(a, b):
    return _cdiv(a, b) * b


def _accumulate_groups(x_ref, y_ref, carry, num_groups):
    """Fused single pass over `num_groups` (8,128) row-groups of the block.

    Each chunk of x/y is loaded once, cast to f32, and all five moment
    accumulators (loop-carried vregs) are updated before the next load.
    """
    if num_groups <= 0:
        return carry

    def body(g, c):
        sx, sy, sxy, sxx, syy = c
        r0 = pl.multiple_of(g * _SUBLANES, _SUBLANES)
        xg = x_ref[pl.ds(r0, _SUBLANES), :].astype(jnp.float32)
        yg = y_ref[pl.ds(r0, _SUBLANES), :].astype(jnp.float32)
        return (sx + xg, sy + yg, sxy + xg * yg, sxx + xg * xg, syy + yg * yg)

    unroll = max(1, math.gcd(num_groups, 8))
    return lax.fori_loop(0, num_groups, body, carry, unroll=unroll)


def _inv_corr_moments_kernel(x_ref, y_ref, o_ref, *,
                             blocks_per_split, n_blocks, block_rows,
                             partial_valid_rows, has_skip):
    """Accumulates the five raw moments of one split into o_ref (1,5,8,128)."""
    c = pl.program_id(0)        # split (parallel) axis
    i = pl.program_id(1)        # streaming (arbitrary) axis
    gb = c * blocks_per_split + i   # global row-block index

    @pl.when(i == 0)
    def _init():
        o_ref[...] = jnp.zeros_like(o_ref)

    def read_acc():
        return tuple(o_ref[0, k] for k in range(_NUM_MOMENTS))

    def write_acc(carry):
        for k in range(_NUM_MOMENTS):
            o_ref[0, k] = carry[k]

    has_partial = partial_valid_rows is not None

    def _full_block():
        # Steady-state path: every row of the block is valid -> mask-free.
        write_acc(_accumulate_groups(x_ref, y_ref, read_acc(),
                                     block_rows // _SUBLANES))

    full_cond = None
    if has_skip:
        full_cond = gb < n_blocks          # skip clamped overhang grid steps
    if has_partial:
        not_partial = gb != (n_blocks - 1)
        full_cond = not_partial if full_cond is None else (full_cond & not_partial)

    if full_cond is None:
        _full_block()
    else:
        pl.when(full_cond)(_full_block)

    if has_partial:
        # Last block: mask-free loop over the fully-valid row-groups, then a
        # single select-masked (never multiplicative) ragged row-group.
        @pl.when(gb == n_blocks - 1)
        def _partial_block():
            full_groups = partial_valid_rows // _SUBLANES
            tail_rows = partial_valid_rows % _SUBLANES
            carry = _accumulate_groups(x_ref, y_ref, read_acc(), full_groups)
            if tail_rows:
                r0 = full_groups * _SUBLANES      # static, within the block
                row_ids = lax.broadcasted_iota(jnp.int32, (_SUBLANES, _LANES), 0)
                valid = row_ids < tail_rows       # compile-time constant mask
                xg = jnp.where(valid,
                               x_ref[pl.ds(r0, _SUBLANES), :].astype(jnp.float32),
                               0.0)
                yg = jnp.where(valid,
                               y_ref[pl.ds(r0, _SUBLANES), :].astype(jnp.float32),
                               0.0)
                sx, sy, sxy, sxx, syy = carry
                carry = (sx + xg, sy + yg, sxy + xg * yg,
                         sxx + xg * xg, syy + yg * yg)
            write_acc(carry)


def inv_correlation_coefficient_loss(y_true, y_pred, *,
                                     block_bytes=_DEFAULT_BLOCK_BYTES):
    """Pallas TPU implementation of InvCorrelationCoefficientLoss.forward."""
    assert y_true.shape == y_pred.shape, "y_true / y_pred must have equal shapes"
    n_true = int(y_true.size)
    # NOTE: n_true == 1 yields NaN (division by N-1 == 0), matching torch.std
    # of a single element.

    x = jnp.ravel(y_true)
    y = jnp.ravel(y_pred)

    n_rows = _cdiv(n_true, _LANES)

    # Rows per block: keep native-dtype DMA bytes per input per grid step at
    # ~block_bytes regardless of dtype (bf16 gets 2x the rows of f32, etc.).
    itemsize = max(y_true.dtype.itemsize, y_pred.dtype.itemsize)
    block_rows_target = max(
        _SUBLANES, _round_up(block_bytes // (_LANES * itemsize), _SUBLANES))

    if n_rows <= block_rows_target:
        # Single block covering the whole array.  Pad rows to a sublane
        # multiple so the in-kernel (8,128) chunk loop never reads past the
        # buffer; every row is then valid (zero padding adds 0 to raw sums).
        rows = _round_up(n_rows, _SUBLANES)
        block_rows = rows
        num_splits = 1
        n_blocks = 1
        partial_valid_rows = None
    else:
        rows = n_rows
        block_rows = block_rows_target
        num_splits = _NUM_SPLITS
        n_blocks = _cdiv(n_rows, block_rows)
        rem = n_rows % block_rows
        partial_valid_rows = rem if rem else None

    pad = rows * _LANES - n_true
    if pad:
        # Zero padding is harmless: all accumulated quantities are raw sums and
        # we divide by the true element count N.
        # TODO(synk): jnp.pad copies the whole array; a fully pad-free ragged
        # lane tail would need a separate scalar tail pass.
        x = jnp.pad(x, (0, pad))
        y = jnp.pad(y, (0, pad))

    x2d = x.reshape(rows, _LANES)
    y2d = y.reshape(rows, _LANES)

    blocks_per_split = _cdiv(n_blocks, num_splits)
    has_skip = num_splits * blocks_per_split > n_blocks
    last_block = n_blocks - 1

    def in_index_map(c, i):
        # Clamp the (at most num_splits-1) overhanging grid steps of the last
        # split onto the last real block; the kernel skips their compute.
        return (jnp.minimum(c * blocks_per_split + i, last_block), 0)

    kernel = functools.partial(
        _inv_corr_moments_kernel,
        blocks_per_split=blocks_per_split,
        n_blocks=n_blocks,
        block_rows=block_rows,
        partial_valid_rows=partial_valid_rows,
        has_skip=has_skip,
    )

    cost = pl.CostEstimate(
        flops=8 * n_true,
        transcendentals=0,
        bytes_accessed=n_true * (y_true.dtype.itemsize + y_pred.dtype.itemsize)
        + num_splits * _NUM_MOMENTS * _SUBLANES * _LANES * 4,
    )

    partials = pl.pallas_call(
        kernel,
        out_shape=jax.ShapeDtypeStruct(
            (num_splits, _NUM_MOMENTS, _SUBLANES, _LANES), jnp.float32),
        grid_spec=pltpu.PrefetchScalarGridSpec(
            num_scalar_prefetch=0,
            grid=(num_splits, blocks_per_split),
            in_specs=[
                pl.BlockSpec((block_rows, _LANES), in_index_map),
                pl.BlockSpec((block_rows, _LANES), in_index_map),
            ],
            out_specs=pl.BlockSpec(
                (1, _NUM_MOMENTS, _SUBLANES, _LANES),
                lambda c, i: (c, 0, 0, 0)),
        ),
        compiler_params=pltpu.CompilerParams(
            dimension_semantics=("parallel", "arbitrary"),
            vmem_limit_bytes=32 * 1024 * 1024,
        ),
        cost_estimate=cost,
    )(x2d, y2d)

    # Tiny final combine (five cross-lane sums + scalar corr math) in the
    # wrapper -- removes the lane-sparse (1,1) store and lets the v7x per-core
    # partials be merged trivially.
    m = jnp.sum(partials, axis=(0, 2, 3))
    sx, sy, sxy, sxx, syy = m[0], m[1], m[2], m[3], m[4]

    n = jnp.float32(n_true)
    mean_x = sx / n
    mean_y = sy / n
    covariance = sxy / n - mean_x * mean_y         # mean((x-mx)*(y-my))
    # torch.std is unbiased (divide by N-1); clamp tiny negative fp residue so
    # sqrt never produces NaN for (near-)constant inputs.
    # TODO(synk): raw-moment formulas in f32 cancel badly when |mean| >> std; a
    # shifted/compensated accumulation would be needed for such extreme inputs.
    var_x = jnp.maximum((sxx - n * mean_x * mean_x) / (n - 1.0), 0.0)
    var_y = jnp.maximum((syy - n * mean_y * mean_y) / (n - 1.0), 0.0)
    corr = covariance / (jnp.sqrt(var_x) * jnp.sqrt(var_y) + jnp.float32(1e-5))
    return jnp.float32(1.0) - corr * corr


def _reference(y_true, y_pred):
    x = jnp.ravel(y_true).astype(jnp.float32)
    y = jnp.ravel(y_pred).astype(jnp.float32)
    mx = jnp.mean(x)
    my = jnp.mean(y)
    cov = jnp.mean((x - mx) * (y - my))
    sx = jnp.std(x, ddof=1)
    sy = jnp.std(y, ddof=1)
    corr = cov / (sx * sy + 1e-5)
    return 1.0 - corr**2


if __name__ == "__main__":
    key = jax.random.PRNGKey(0)

    def _make_pair(k, shape, dtype):
        k1, k2 = jax.random.split(k)
        yt = jax.random.normal(k1, shape, dtype=jnp.float32)
        yp = 0.7 * yt + 0.3 * jax.random.normal(k2, shape, dtype=jnp.float32)
        return yt.astype(dtype), yp.astype(dtype)

    # 1) Primary small NCHW-style case (2048 elems, single-block zero-copy).
    # 2) Ragged tiny case (105 elems, lane-pad path).
    # 3) 320k-element case with a reduced block size to exercise multi-block
    #    streaming, the 2-way parallel split, the partial-block mask, and the
    #    clamped overhang step (3 blocks over a (2,2) grid).
    # 4) bf16 case exercising the in-kernel cast + dtype-scaled block sizing.
    cases = [
        ((2, 4, 16, 16), jnp.float32, {}),
        ((3, 5, 7), jnp.float32, {}),
        ((2, 4, 200, 200), jnp.float32, {"block_bytes": 512 * 1024}),
        ((4, 8, 16, 16), jnp.bfloat16, {}),
    ]

    keys = jax.random.split(key, len(cases))
    for (shape, dtype, kwargs), k in zip(cases, keys):
        y_true, y_pred = _make_pair(k, shape, dtype)
        loss = jax.block_until_ready(
            inv_correlation_coefficient_loss(y_true, y_pred, **kwargs))
        ref = jax.block_until_ready(_reference(y_true, y_pred))
        assert jnp.allclose(loss, ref, atol=2e-4, rtol=2e-3), (shape, dtype, loss, ref)

    print("KERNEL_OK")
</pallas_src>

<mosaic_0001>
module attributes {stable_mosaic.version = 11 : i64} {
  func.func @_inv_corr_moments_kernel(%arg0: i32, %arg1: i32, %arg2: memref<16x128xf32, #tpu.memory_space<vmem>>, %arg3: memref<16x128xf32, #tpu.memory_space<vmem>>, %arg4: memref<1x5x8x128xf32, #tpu.memory_space<vmem>>) attributes {dimension_semantics = [#tpu.dimension_semantics<parallel>, #tpu.dimension_semantics<arbitrary>], iteration_bounds = array<i64: 1, 1>, scalar_prefetch = 0 : i64, scratch_operands = 0 : i64, tpu.core_type = #tpu.core_type<tc>, window_params = [{transform_indices = @transform_0, window_bounds = array<i64: 16, 128>}, {transform_indices = @transform_1, window_bounds = array<i64: 16, 128>}, {transform_indices = @transform_2, window_bounds = array<i64: 1, 5, 8, 128>}]} {
    %c0_i32 = arith.constant 0 : i32
    %0 = arith.cmpi eq, %arg1, %c0_i32 : i32
    %1 = arith.extui %0 : i1 to i32
    %c0_i32_0 = arith.constant 0 : i32
    %2 = arith.cmpi ne, %1, %c0_i32_0 : i32
    scf.if %2 {
      %cst = arith.constant 0.000000e+00 : f32
      %56 = vector.broadcast %cst : f32 to vector<1x5x8x128xf32>
      %c0_42 = arith.constant 0 : index
      %c0_43 = arith.constant 0 : index
      %c0_44 = arith.constant 0 : index
      %c0_45 = arith.constant 0 : index
      %57 = vector.load %arg4[%c0_42, %c0_43, %c0_44, %c0_45] : memref<1x5x8x128xf32, #tpu.memory_space<vmem>>, vector<1x5x8x128xf32>
      tpu.vector_store %arg4[%c0_42, %c0_43, %c0_44, %c0_45], %56 {strides = array<i32>} : memref<1x5x8x128xf32, #tpu.memory_space<vmem>>, vector<1x5x8x128xf32>,
    } else {
    }
    %c0 = arith.constant 0 : index
    %c0_1 = arith.constant 0 : index
    %c0_2 = arith.constant 0 : index
    %c0_3 = arith.constant 0 : index
    %3 = vector.load %arg4[%c0, %c0_1, %c0_2, %c0_3] : memref<1x5x8x128xf32, #tpu.memory_space<vmem>>, vector<1x1x8x128xf32>
    %4 = vector.shape_cast %3 : vector<1x1x8x128xf32> to vector<8x128xf32>
    %c0_4 = arith.constant 0 : index
    %c1 = arith.constant 1 : index
    %c0_5 = arith.constant 0 : index
    %c0_6 = arith.constant 0 : index
    %5 = vector.load %arg4[%c0_4, %c1, %c0_5, %c0_6] : memref<1x5x8x128xf32, #tpu.memory_space<vmem>>, vector<1x1x8x128xf32>
    %6 = vector.shape_cast %5 : vector<1x1x8x128xf32> to vector<8x128xf32>
    %c0_7 = arith.constant 0 : index
    %c2 = arith.constant 2 : index
    %c0_8 = arith.constant 0 : index
    %c0_9 = arith.constant 0 : index
    %7 = vector.load %arg4[%c0_7, %c2, %c0_8, %c0_9] : memref<1x5x8x128xf32, #tpu.memory_space<vmem>>, vector<1x1x8x128xf32>
    %8 = vector.shape_cast %7 : vector<1x1x8x128xf32> to vector<8x128xf32>
    %c0_10 = arith.constant 0 : index
    %c3 = arith.constant 3 : index
    %c0_11 = arith.constant 0 : index
    %c0_12 = arith.constant 0 : index
    %9 = vector.load %arg4[%c0_10, %c3, %c0_11, %c0_12] : memref<1x5x8x128xf32, #tpu.memory_space<vmem>>, vector<1x1x8x128xf32>
    %10 = vector.shape_cast %9 : vector<1x1x8x128xf32> to vector<8x128xf32>
    %c0_13 = arith.constant 0 : index
    %c4 = arith.constant 4 : index
    %c0_14 = arith.constant 0 : index
    %c0_15 = arith.constant 0 : index
    %11 = vector.load %arg4[%c0_13, %c4, %c0_14, %c0_15] : memref<1x5x8x128xf32, #tpu.memory_space<vmem>>, vector<1x1x8x128xf32>
    %12 = vector.shape_cast %11 : vector<1x1x8x128xf32> to vector<8x128xf32>
    %c0_i32_16 = arith.constant 0 : i32
    %c8_i32 = arith.constant 8 : i32
    %13 = arith.muli %c0_i32_16, %c8_i32 : i32
    %14 = tpu.assume_multiple %13, 8 : i32
    %15 = arith.index_cast %14 : i32 to index
    %c0_17 = arith.constant 0 : index
    %16 = vector.load %arg2[%15, %c0_17] : memref<16x128xf32, #tpu.memory_space<vmem>>, vector<8x128xf32>
    %17 = arith.index_cast %14 : i32 to index
    %c0_18 = arith.constant 0 : index
    %18 = vector.load %arg3[%17, %c0_18] : memref<16x128xf32, #tpu.memory_space<vmem>>, vector<8x128xf32>
    %19 = arith.addf %4, %16 : vector<8x128xf32>
    %20 = arith.addf %6, %18 : vector<8x128xf32>
    %21 = arith.mulf %16, %18 : vector<8x128xf32>
    %22 = arith.addf %8, %21 : vector<8x128xf32>
    %23 = arith.mulf %16, %16 : vector<8x128xf32>
    %24 = arith.addf %10, %23 : vector<8x128xf32>
    %25 = arith.mulf %18, %18 : vector<8x128xf32>
    %26 = arith.addf %12, %25 : vector<8x128xf32>
    %c1_i32 = arith.constant 1 : i32
    %c8_i32_19 = arith.constant 8 : i32
    %27 = arith.muli %c1_i32, %c8_i32_19 : i32
    %28 = tpu.assume_multiple %27, 8 : i32
    %29 = arith.index_cast %28 : i32 to index
    %c0_20 = arith.constant 0 : index
    %30 = vector.load %arg2[%29, %c0_20] : memref<16x128xf32, #tpu.memory_space<vmem>>, vector<8x128xf32>
    %31 = arith.index_cast %28 : i32 to index
    %c0_21 = arith.constant 0 : index
    %32 = vector.load %arg3[%31, %c0_21] : memref<16x128xf32, #tpu.memory_space<vmem>>, vector<8x128xf32>
    %33 = arith.addf %19, %30 : vector<8x128xf32>
    %34 = arith.addf %20, %32 : vector<8x128xf32>
    %35 = arith.mulf %30, %32 : vector<8x128xf32>
    %36 = arith.addf %22, %35 : vector<8x128xf32>
    %37 = arith.mulf %30, %30 : vector<8x128xf32>
    %38 = arith.addf %24, %37 : vector<8x128xf32>
    %39 = arith.mulf %32, %32 : vector<8x128xf32>
    %40 = arith.addf %26, %39 : vector<8x128xf32>
    %c2_i32 = arith.constant 2 : i32
    %c0_22 = arith.constant 0 : index
    %c0_23 = arith.constant 0 : index
    %c0_24 = arith.constant 0 : index
    %c0_25 = arith.constant 0 : index
    %41 = vector.load %arg4[%c0_22, %c0_23, %c0_24, %c0_25] : memref<1x5x8x128xf32, #tpu.memory_space<vmem>>, vector<1x1x8x128xf32>
    %42 = vector.shape_cast %41 : vector<1x1x8x128xf32> to vector<8x128xf32>
    %43 = vector.shape_cast %33 : vector<8x128xf32> to vector<1x1x8x128xf32>
    tpu.vector_store %arg4[%c0_22, %c0_23, %c0_24, %c0_25], %43 {strides = array<i32>} : memref<1x5x8x128xf32, #tpu.memory_space<vmem>>, vector<1x1x8x128xf32>,
    %c0_26 = arith.constant 0 : index
    %c1_27 = arith.constant 1 : index
    %c0_28 = arith.constant 0 : index
    %c0_29 = arith.constant 0 : index
    %44 = vector.load %arg4[%c0_26, %c1_27, %c0_28, %c0_29] : memref<1x5x8x128xf32, #tpu.memory_space<vmem>>, vector<1x1x8x128xf32>
    %45 = vector.shape_cast %44 : vector<1x1x8x128xf32> to vector<8x128xf32>
    %46 = vector.shape_cast %34 : vector<8x128xf32> to vector<1x1x8x128xf32>
    tpu.vector_store %arg4[%c0_26, %c1_27, %c0_28, %c0_29], %46 {strides = array<i32>} : memref<1x5x8x128xf32, #tpu.memory_space<vmem>>, vector<1x1x8x128xf32>,
    %c0_30 = arith.constant 0 : index
    %c2_31 = arith.constant 2 : index
    %c0_32 = arith.constant 0 : index
    %c0_33 = arith.constant 0 : index
    %47 = vector.load %arg4[%c0_30, %c2_31, %c0_32, %c0_33] : memref<1x5x8x128xf32, #tpu.memory_space<vmem>>, vector<1x1x8x128xf32>
    %48 = vector.shape_cast %47 : vector<1x1x8x128xf32> to vector<8x128xf32>
    %49 = vector.shape_cast %36 : vector<8x128xf32> to vector<1x1x8x128xf32>
    tpu.vector_store %arg4[%c0_30, %c2_31, %c0_32, %c0_33], %49 {strides = array<i32>} : memref<1x5x8x128xf32, #tpu.memory_space<vmem>>, vector<1x1x8x128xf32>,
    %c0_34 = arith.constant 0 : index
    %c3_35 = arith.constant 3 : index
    %c0_36 = arith.constant 0 : index
    %c0_37 = arith.constant 0 : index
    %50 = vector.load %arg4[%c0_34, %c3_35, %c0_36, %c0_37] : memref<1x5x8x128xf32, #tpu.memory_space<vmem>>, vector<1x1x8x128xf32>
    %51 = vector.shape_cast %50 : vector<1x1x8x128xf32> to vector<8x128xf32>
    %52 = vector.shape_cast %38 : vector<8x128xf32> to vector<1x1x8x128xf32>
    tpu.vector_store %arg4[%c0_34, %c3_35, %c0_36, %c0_37], %52 {strides = array<i32>} : memref<1x5x8x128xf32, #tpu.memory_space<vmem>>, vector<1x1x8x128xf32>,
    %c0_38 = arith.constant 0 : index
    %c4_39 = arith.constant 4 : index
    %c0_40 = arith.constant 0 : index
    %c0_41 = arith.constant 0 : index
    %53 = vector.load %arg4[%c0_38, %c4_39, %c0_40, %c0_41] : memref<1x5x8x128xf32, #tpu.memory_space<vmem>>, vector<1x1x8x128xf32>
    %54 = vector.shape_cast %53 : vector<1x1x8x128xf32> to vector<8x128xf32>
    %55 = vector.shape_cast %40 : vector<8x128xf32> to vector<1x1x8x128xf32>
    tpu.vector_store %arg4[%c0_38, %c4_39, %c0_40, %c0_41], %55 {strides = array<i32>} : memref<1x5x8x128xf32, #tpu.memory_space<vmem>>, vector<1x1x8x128xf32>,
    return
  }
  func.func @transform_0(%arg0: i32, %arg1: i32) -> (i32, i32) {
    %c1_i32 = arith.constant 1 : i32
    %0 = arith.muli %arg0, %c1_i32 : i32
    %1 = arith.addi %0, %arg1 : i32
    %c0_i32 = arith.constant 0 : i32
    %2 = arith.minsi %1, %c0_i32 : i32
    %c0_i32_0 = arith.constant 0 : i32
    %c0_i32_1 = arith.constant 0 : i32
    return %2, %c0_i32_0 : i32, i32
  }
  func.func @transform_1(%arg0: i32, %arg1: i32) -> (i32, i32) {
    %c1_i32 = arith.constant 1 : i32
    %0 = arith.muli %arg0, %c1_i32 : i32
    %1 = arith.addi %0, %arg1 : i32
    %c0_i32 = arith.constant 0 : i32
    %2 = arith.minsi %1, %c0_i32 : i32
    %c0_i32_0 = arith.constant 0 : i32
    %c0_i32_1 = arith.constant 0 : i32
    return %2, %c0_i32_0 : i32, i32
  }
  func.func @transform_2(%arg0: i32, %arg1: i32) -> (i32, i32, i32, i32) {
    %c0_i32 = arith.constant 0 : i32
    %c0_i32_0 = arith.constant 0 : i32
    %c0_i32_1 = arith.constant 0 : i32
    %c0_i32_2 = arith.constant 0 : i32
    return %arg0, %c0_i32, %c0_i32_0, %c0_i32_1 : i32, i32, i32, i32
  }
}

</mosaic_0001>

<bundles_post_ra>
// kernel: tpu_custom_call.1
= control target key start
LH: loop header
LB: loop body
LE: loop exit
PB: predicated region body
PF: predicated region fallthrough
CT: control target
= control target key end

     0   :  { %7 = vsyncpa [#allocation3], 0  ;;  %s255_s0 = inlined_call_operand.hbm [shape: f32[16,128], index: 0, kind: input, shape index: {}]   ;;  %s256_s1 = inlined_call_operand.hbm [shape: f32[16,128], index: 1, kind: input, shape index: {}]   ;;  %s257_s2 = inlined_call_operand.hbm [shape: f32[1,5,8,128], index: 2, kind: output, shape index: {}]  }
   0x1   :  { %8 = vsyncpa [#allocation6], 0 }
   0x2   :  { %9 = vsyncpa [#allocation4], 0  ;;  %s20_s11 = sshll.u32 %s255_s0, 4  ;;  %s217_s12 = smov [#allocation2]   ;;  %s21_s11 = int_to_ptr.hbm [resolvable:$true] %s20_s11 }
   0x3   :  { %s22_s13 = sshll.u32 %s217_s12, 4  ;;  %s39_s16 = sshll.u32 %s256_s1, 4  ;;  %s23_s13 = int_to_ptr.vmem [resolvable:$true] %s22_s13  ;;  %s40_s16 = int_to_ptr.hbm [resolvable:$true] %s39_s16 }
   0x4   :  { %s218_s17 = smov 128   ;;  %s219_s18 = smov 8  }
   0x5   :  { %28 = dma.hbm_to_vmem [thread:$0]  %s21_s11, 256, %s23_s13, [#allocation3], %s218_s17, %s218_s17, %s219_s18  }
   0x6   :  { %s220_s19 = smov [#allocation5]  }
   0x7   :  { %s41_s20 = sshll.u32 %s220_s19, 4  ;;  %s42_s20 = int_to_ptr.vmem [resolvable:$true] %s41_s20 }
   0x8   :  { %47 = dma.hbm_to_vmem [thread:$0]  %s40_s16, 256, %s42_s20, [#allocation6], %s218_s17, %s218_s17, %s219_s18  }
   0x9   :  { %211 = dma.done.wait [#allocation3], 256  }
   0xa   :  { %212 = vsyncadd [#allocation3], 4294967040 }
   0xb   :  { %213 = dma.done.wait [#allocation6], 256  }
   0xc   :  { %214 = vsyncadd [#allocation6], 4294967040  ;;  %v82_v0 = vld [vmem:[#allocation2] sm:$0xff]  ;;  %v93_v1 = vld [vmem:[#allocation2 + $0x8] sm:$0xff]  ;;  %s221_s0 = smov [#allocation7]   ;;  %s115_s23 = sshll.u32 %s257_s2, 4  ;;  %s116_s23 = int_to_ptr.hbm [resolvable:$true] %s115_s23 }
   0xd   :  { %v83_v2 = vld [vmem:[#allocation5] sm:$0xff]  ;;  %v95_v3 = vld [vmem:[#allocation5 + $0x8] sm:$0xff]  ;;  %v88_v5 = vmul.f32 %v82_v0, %v82_v0  ;;  %v100_v7 = vmul.f32 %v93_v1, %v93_v1  ;;  %v96_v10 = vadd.f32 %v93_v1, %v82_v0  ;;  %s113_s1 = sshll.u32 %s221_s0, 4  ;;  %s114_s1 = int_to_ptr.vmem [resolvable:$true] %s113_s1 }
   0xe   :  { %v86_v4 = vmul.f32 %v83_v2, %v82_v0  ;;  %v98_v6 = vmul.f32 %v95_v3, %v93_v1  ;;  %v90_v8 = vmul.f32 %v83_v2, %v83_v2  ;;  %v102_v9 = vmul.f32 %v95_v3, %v95_v3 }
   0xf   :  { %v97_v11 = vadd.f32 %v95_v3, %v83_v2  ;;  %104 = vst [vmem:[#allocation7] sm:$0xff] %v96_v10  ;;  %v101_v13 = vadd.f32 %v100_v7, %v88_v5 }
  0x10   :  { %v99_v12 = vadd.f32 %v98_v6, %v86_v4  ;;  %v103_v14 = vadd.f32 %v102_v9, %v90_v8 }
  0x11   :  { %105 = vst [vmem:[#allocation7 + $0x8] sm:$0xff] %v97_v11 }
  0x12   :  { %106 = vst [vmem:[#allocation7 + $0x10] sm:$0xff] %v99_v12 }
  0x13   :  { %107 = vst [vmem:[#allocation7 + $0x18] sm:$0xff] %v101_v13 }
  0x14   :  { %108 = vst [vmem:[#allocation7 + $0x20] sm:$0xff] %v103_v14 }
  0x15   :  { %121 = dma.vmem_to_hbm [thread:$0]  %s114_s1, 640, %s116_s23, [#allocation4], %s218_s17, %s218_s17, %s219_s18  }
  0x16   :  { %215 = dma.done.wait [#allocation4], 640  }
  0x17   :  { %216 = vsyncadd [#allocation4], 4294966656 }
  0x18   :  { %126 = vsyncpa [#allocation3], 1 }
  0x19   :  { %127 = vsyncpa [#allocation6], 1 }
  0x1a   :  { %128 = vsyncpa [#allocation4], 1 }

</bundles_post_ra>
